<compile_context>
chip_gen: v7x
topology: tpu7x:2x2x1
jax: 0.10.0
libtpu: 0.0.40
codegen_flags: <defaults>
</compile_context>

<pallas_src>
import functools
import math

import jax
import jax.numpy as jnp
from jax import lax
from jax.experimental import pallas as pl
from jax.experimental.pallas import tpu as pltpu


# ---------------------------------------------------------------------------
# Stage 1: Q/K/V projections (bf16 MXU, f32 accumulate), K/V projected once.
# ---------------------------------------------------------------------------
def qkv_proj_kernel(q_ref, k_ref, v_ref, wq_ref, wk_ref, wv_ref, b_ref,
                    qp_ref, kp_ref, vp_ref):
    qb = q_ref[0].astype(jnp.bfloat16)   # (TS, E)
    kb = k_ref[0].astype(jnp.bfloat16)
    vb = v_ref[0].astype(jnp.bfloat16)

    qp_ref[0] = (jnp.dot(qb, wq_ref[...], preferred_element_type=jnp.float32)
                 + b_ref[0]).astype(qp_ref.dtype)
    kp_ref[0] = (jnp.dot(kb, wk_ref[...], preferred_element_type=jnp.float32)
                 + b_ref[1]).astype(kp_ref.dtype)
    vp_ref[0] = (jnp.dot(vb, wv_ref[...], preferred_element_type=jnp.float32)
                 + b_ref[2]).astype(vp_ref.dtype)


# ---------------------------------------------------------------------------
# Stage 2: per-head-group attention + output projection, accumulated over
# groups directly into the resident output block.
# ---------------------------------------------------------------------------
def attn_kernel(qp_ref, kp_ref, vp_ref, wo_ref, bo_ref, o_ref, *,
                group, head_dim):
    g = pl.program_id(2)

    qg = qp_ref[0]   # (TQ, G*D) bf16, 1/scale already folded in
    kg = kp_ref[0]   # (S,  G*D) bf16
    vg = vp_ref[0]   # (S,  G*D) bf16

    ctx_parts = []
    for h in range(group):               # static unroll over heads in the group
        lo = h * head_dim
        hi = lo + head_dim
        qh = qg[:, lo:hi]                # (TQ, D)
        kh = kg[:, lo:hi]                # (S,  D)
        vh = vg[:, lo:hi]                # (S,  D)

        # energy = Qh @ Kh^T via contraction over the last dims (no explicit .T).
        energy = lax.dot_general(qh, kh, (((1,), (1,)), ((), ())),
                                 preferred_element_type=jnp.float32)  # (TQ, S)

        # Numerically-stable softmax in f32; reciprocal on the EUP.
        energy = energy - jnp.max(energy, axis=-1, keepdims=True)
        p = jnp.exp(energy)
        p = p * pl.reciprocal(jnp.sum(p, axis=-1, keepdims=True), approx=True)

        ctx_parts.append(jnp.dot(p.astype(jnp.bfloat16), vh,
                                 preferred_element_type=jnp.float32))  # (TQ, D)

    ctx = ctx_parts[0] if group == 1 else jnp.concatenate(ctx_parts, axis=-1)

    # One wide output-projection matmul over the whole group: (TQ,G*D)@(G*D,E).
    contrib = jnp.dot(ctx.astype(jnp.bfloat16), wo_ref[0],
                      preferred_element_type=jnp.float32)              # (TQ, E)

    @pl.when(g == 0)
    def _():
        o_ref[0] = jnp.broadcast_to(bo_ref[...], contrib.shape)

    o_ref[0] += contrib


# ---------------------------------------------------------------------------
# Host-side tiling / grouping heuristics.
# ---------------------------------------------------------------------------
def _choose_seq_tile(S, batch):
    """Largest tile <= 512 dividing S (multiple of 8 unless it is the full S).
    When batch == 1, prefer >= 2 tiles so both v7x TensorCores get work."""
    max_tile = min(S, 512)
    if batch == 1 and S % 16 == 0:
        max_tile = min(max_tile, S // 2)
    for t in range(max_tile, 0, -1):
        if S % t == 0 and (t % 8 == 0 or t == S):
            return t
    return S


def _choose_head_group(heads, head_dim):
    """Heads per grid step: prefer the smallest G with G*D >= 256 (v6e/v7x MXU
    width) whose block width G*D is a multiple of 128 (BlockSpec-legal when it
    is not the full E); otherwise process all heads in one group (width == E,
    always legal)."""
    for g in range(1, heads):
        if heads % g == 0 and (g * head_dim) % 128 == 0 and g * head_dim >= 256:
            return g
    return heads


# ---------------------------------------------------------------------------
# Wrapper.
# ---------------------------------------------------------------------------
def multi_headed_attention(query, key, value, params, *, heads):
    """query/key/value: (B, S, E) float32. params: dict of (E,E)/(E,) weights."""
    B, S, E = query.shape
    assert E % heads == 0
    D = E // heads
    scale = math.sqrt(float(D))

    TQ = _choose_seq_tile(S, B)
    num_q = S // TQ
    G = _choose_head_group(heads, D)
    GD = G * D
    num_groups = heads // G

    # Host repack: PyTorch Linear is y = x @ W.T + b with W of shape (out, in).
    # Scale is folded into the Q weight/bias; MXU operands are bf16.
    wq_t = (params["wq"].T / scale).astype(jnp.bfloat16)          # (E, E)
    wk_t = params["wk"].T.astype(jnp.bfloat16)                    # (E, E)
    wv_t = params["wv"].T.astype(jnp.bfloat16)                    # (E, E)
    bqkv = jnp.stack([params["bq"] / scale, params["bk"], params["bv"]],
                     axis=0).reshape(3, 1, E).astype(jnp.float32)  # (3, 1, E)
    wo_g = params["wo"].T.reshape(num_groups, GD, E).astype(jnp.bfloat16)
    bo2 = params["bo"].reshape(1, E).astype(jnp.float32)

    # ---- Stage 1: project Q/K/V once (outputs bf16). ----
    TS = _choose_seq_tile(S, B)
    num_s = S // TS
    proj_out_shape = (jax.ShapeDtypeStruct((B, S, E), jnp.bfloat16),) * 3
    seq_spec = pl.BlockSpec((1, TS, E), lambda b, si: (b, si, 0))
    qp, kp, vp = pl.pallas_call(
        qkv_proj_kernel,
        out_shape=proj_out_shape,
        grid_spec=pltpu.PrefetchScalarGridSpec(
            num_scalar_prefetch=0,
            grid=(B, num_s),
            in_specs=[
                seq_spec, seq_spec, seq_spec,
                pl.BlockSpec((E, E), lambda b, si: (0, 0)),
                pl.BlockSpec((E, E), lambda b, si: (0, 0)),
                pl.BlockSpec((E, E), lambda b, si: (0, 0)),
                pl.BlockSpec((3, 1, E), lambda b, si: (0, 0, 0)),
            ],
            out_specs=[seq_spec, seq_spec, seq_spec],
        ),
        compiler_params=pltpu.CompilerParams(
            dimension_semantics=("parallel", "parallel")),
    )(query, key, value, wq_t, wk_t, wv_t, bqkv)

    # ---- Stage 2: attention + output projection, reduce over head groups. ----
    # Rough double-buffered VMEM footprint; raise the scoped limit only when
    # the default (~32 MiB) would be exceeded.
    attn_vmem_est = (2 * (TQ * GD + 2 * S * GD + GD * E) * 2   # bf16 input blocks
                     + 2 * TQ * E * 4                          # f32 output block
                     + 2 * TQ * S * 4)                         # softmax intermediates
    vmem_limit = None
    if attn_vmem_est > 32 * 1024 * 1024:
        # TODO(synk): switch to flash-style KV tiling instead for very long S
        #             (v7x physical VMEM is only 64 MiB).
        vmem_limit = int(min(attn_vmem_est * 2, 96 * 1024 * 1024))

    flops = 4 * B * heads * S * S * D + 2 * B * S * E * E
    transcendentals = B * heads * S * S
    bytes_accessed = 2 * 3 * B * S * E + 4 * B * S * E + 2 * heads * D * E + 4 * E
    cost = pl.CostEstimate(flops=int(flops),
                           transcendentals=int(transcendentals),
                           bytes_accessed=int(bytes_accessed))

    kernel = functools.partial(attn_kernel, group=G, head_dim=D)
    out = pl.pallas_call(
        kernel,
        out_shape=jax.ShapeDtypeStruct((B, S, E), jnp.float32),
        grid_spec=pltpu.PrefetchScalarGridSpec(
            num_scalar_prefetch=0,
            grid=(B, num_q, num_groups),
            in_specs=[
                pl.BlockSpec((1, TQ, GD), lambda b, qi, g: (b, qi, g)),  # Qp tile
                pl.BlockSpec((1, S, GD), lambda b, qi, g: (b, 0, g)),    # Kp (group)
                pl.BlockSpec((1, S, GD), lambda b, qi, g: (b, 0, g)),    # Vp (group)
                pl.BlockSpec((1, GD, E), lambda b, qi, g: (g, 0, 0)),    # Wo (group)
                pl.BlockSpec((1, E), lambda b, qi, g: (0, 0)),           # bo
            ],
            out_specs=pl.BlockSpec((1, TQ, E), lambda b, qi, g: (b, qi, 0)),
        ),
        compiler_params=pltpu.CompilerParams(
            dimension_semantics=("parallel", "parallel", "arbitrary"),
            vmem_limit_bytes=vmem_limit),
        cost_estimate=cost,
    )(qp, kp, vp, wo_g, bo2)

    return out.astype(query.dtype)


# ---------------------------------------------------------------------------
# Plain-JAX reference (eval mode, no mask) and self-test.
# ---------------------------------------------------------------------------
def reference_mha(query, key, value, params, *, heads):
    B, S, E = query.shape
    D = E // heads
    scale = math.sqrt(float(D))

    def lin(x, w, b):
        return x @ w.T + b

    Q = lin(query, params["wq"], params["bq"])
    K = lin(key, params["wk"], params["bk"])
    V = lin(value, params["wv"], params["bv"])

    def split(x):
        return x.reshape(B, S, heads, D).transpose(0, 2, 1, 3)  # (B,H,S,D)

    Qh, Kh, Vh = split(Q), split(K), split(V)
    energy = jnp.einsum("bhqd,bhkd->bhqk", Qh, Kh) / scale
    attn = jax.nn.softmax(energy, axis=-1)
    x = jnp.einsum("bhqk,bhkd->bhqd", attn, Vh)
    x = x.transpose(0, 2, 1, 3).reshape(B, S, E)
    return lin(x, params["wo"], params["bo"])


if __name__ == "__main__":
    B, S, E, H = 2, 8, 32, 4

    key0 = jax.random.PRNGKey(0)
    ks = jax.random.split(key0, 11)
    bound = 1.0 / math.sqrt(E)  # nn.Linear default init range
    params = {
        "wq": jax.random.uniform(ks[0], (E, E), jnp.float32, -bound, bound),
        "bq": jax.random.uniform(ks[1], (E,), jnp.float32, -bound, bound),
        "wk": jax.random.uniform(ks[2], (E, E), jnp.float32, -bound, bound),
        "bk": jax.random.uniform(ks[3], (E,), jnp.float32, -bound, bound),
        "wv": jax.random.uniform(ks[4], (E, E), jnp.float32, -bound, bound),
        "bv": jax.random.uniform(ks[5], (E,), jnp.float32, -bound, bound),
        "wo": jax.random.uniform(ks[6], (E, E), jnp.float32, -bound, bound),
        "bo": jax.random.uniform(ks[7], (E,), jnp.float32, -bound, bound),
    }

    query = jax.random.normal(ks[8], (B, S, E), jnp.float32)
    key = jax.random.normal(ks[9], (B, S, E), jnp.float32)
    value = jax.random.normal(ks[10], (B, S, E), jnp.float32)

    out = multi_headed_attention(query, key, value, params, heads=H)
    out = jax.block_until_ready(out)

    ref = reference_mha(query, key, value, params, heads=H)
    assert out.shape == (B, S, E)
    # Tolerance accommodates bf16 MXU operands (f32 accumulation) and the EUP
    # approximate reciprocal in the softmax normalization.
    assert jnp.allclose(out, ref, atol=3e-2, rtol=3e-2), "mismatch vs reference"

    print("KERNEL_OK")
</pallas_src>

<mosaic_0001>
module attributes {stable_mosaic.version = 11 : i64} {
  func.func @qkv_proj_kernel(%arg0: i32, %arg1: i32, %arg2: memref<1x8x32xf32, #tpu.memory_space<vmem>>, %arg3: memref<1x8x32xf32, #tpu.memory_space<vmem>>, %arg4: memref<1x8x32xf32, #tpu.memory_space<vmem>>, %arg5: memref<32x32xbf16, #tpu.memory_space<vmem>>, %arg6: memref<32x32xbf16, #tpu.memory_space<vmem>>, %arg7: memref<32x32xbf16, #tpu.memory_space<vmem>>, %arg8: memref<3x1x32xf32, #tpu.memory_space<vmem>>, %arg9: memref<1x8x32xbf16, #tpu.memory_space<vmem>>, %arg10: memref<1x8x32xbf16, #tpu.memory_space<vmem>>, %arg11: memref<1x8x32xbf16, #tpu.memory_space<vmem>>) attributes {dimension_semantics = [#tpu.dimension_semantics<parallel>, #tpu.dimension_semantics<parallel>], iteration_bounds = array<i64: 2, 1>, scalar_prefetch = 0 : i64, scratch_operands = 0 : i64, tpu.core_type = #tpu.core_type<tc>, window_params = [{transform_indices = @transform_0, window_bounds = array<i64: 1, 8, 32>}, {transform_indices = @transform_1, window_bounds = array<i64: 1, 8, 32>}, {transform_indices = @transform_2, window_bounds = array<i64: 1, 8, 32>}, {pipeline_mode = #tpu.pipeline_mode<synchronous>, transform_indices = @transform_3, window_bounds = array<i64: 32, 32>}, {pipeline_mode = #tpu.pipeline_mode<synchronous>, transform_indices = @transform_4, window_bounds = array<i64: 32, 32>}, {pipeline_mode = #tpu.pipeline_mode<synchronous>, transform_indices = @transform_5, window_bounds = array<i64: 32, 32>}, {pipeline_mode = #tpu.pipeline_mode<synchronous>, transform_indices = @transform_6, window_bounds = array<i64: 3, 1, 32>}, {transform_indices = @transform_7, window_bounds = array<i64: 1, 8, 32>}, {transform_indices = @transform_8, window_bounds = array<i64: 1, 8, 32>}, {transform_indices = @transform_9, window_bounds = array<i64: 1, 8, 32>}]} {
    %c0 = arith.constant 0 : index
    %c0_0 = arith.constant 0 : index
    %c0_1 = arith.constant 0 : index
    %0 = vector.load %arg2[%c0, %c0_0, %c0_1] : memref<1x8x32xf32, #tpu.memory_space<vmem>>, vector<1x8x32xf32>
    %1 = vector.shape_cast %0 : vector<1x8x32xf32> to vector<8x32xf32>
    %2 = arith.truncf %1 : vector<8x32xf32> to vector<8x32xbf16>
    %c0_2 = arith.constant 0 : index
    %c0_3 = arith.constant 0 : index
    %c0_4 = arith.constant 0 : index
    %3 = vector.load %arg3[%c0_2, %c0_3, %c0_4] : memref<1x8x32xf32, #tpu.memory_space<vmem>>, vector<1x8x32xf32>
    %4 = vector.shape_cast %3 : vector<1x8x32xf32> to vector<8x32xf32>
    %5 = arith.truncf %4 : vector<8x32xf32> to vector<8x32xbf16>
    %c0_5 = arith.constant 0 : index
    %c0_6 = arith.constant 0 : index
    %c0_7 = arith.constant 0 : index
    %6 = vector.load %arg4[%c0_5, %c0_6, %c0_7] : memref<1x8x32xf32, #tpu.memory_space<vmem>>, vector<1x8x32xf32>
    %7 = vector.shape_cast %6 : vector<1x8x32xf32> to vector<8x32xf32>
    %8 = arith.truncf %7 : vector<8x32xf32> to vector<8x32xbf16>
    %c0_8 = arith.constant 0 : index
    %c0_9 = arith.constant 0 : index
    %9 = vector.load %arg5[%c0_8, %c0_9] : memref<32x32xbf16, #tpu.memory_space<vmem>>, vector<32x32xbf16>
    %cst = arith.constant dense<0.000000e+00> : vector<8x32xf32>
    %10 = tpu.matmul %2, %9, %cst {dimension_numbers = #tpu.dot_dimension_numbers<[1], [0], [0], [1], [0, 0, 1, 1], [], []>} : vector<8x32xbf16>, vector<32x32xbf16>, vector<8x32xf32> -> vector<8x32xf32>
    %c0_10 = arith.constant 0 : index
    %c0_11 = arith.constant 0 : index
    %c0_12 = arith.constant 0 : index
    %11 = vector.load %arg8[%c0_10, %c0_11, %c0_12] : memref<3x1x32xf32, #tpu.memory_space<vmem>>, vector<1x1x32xf32>
    %12 = vector.shape_cast %11 : vector<1x1x32xf32> to vector<1x32xf32>
    %13 = vector.broadcast %12 : vector<1x32xf32> to vector<8x32xf32>
    %14 = arith.addf %10, %13 : vector<8x32xf32>
    %15 = arith.truncf %14 : vector<8x32xf32> to vector<8x32xbf16>
    %c0_13 = arith.constant 0 : index
    %c0_14 = arith.constant 0 : index
    %c0_15 = arith.constant 0 : index
    %16 = vector.load %arg9[%c0_13, %c0_14, %c0_15] : memref<1x8x32xbf16, #tpu.memory_space<vmem>>, vector<1x8x32xbf16>
    %17 = vector.shape_cast %16 : vector<1x8x32xbf16> to vector<8x32xbf16>
    %18 = vector.shape_cast %15 : vector<8x32xbf16> to vector<1x8x32xbf16>
    tpu.vector_store %arg9[%c0_13, %c0_14, %c0_15], %18 {strides = array<i32>} : memref<1x8x32xbf16, #tpu.memory_space<vmem>>, vector<1x8x32xbf16>,
    %c0_16 = arith.constant 0 : index
    %c0_17 = arith.constant 0 : index
    %19 = vector.load %arg6[%c0_16, %c0_17] : memref<32x32xbf16, #tpu.memory_space<vmem>>, vector<32x32xbf16>
    %cst_18 = arith.constant dense<0.000000e+00> : vector<8x32xf32>
    %20 = tpu.matmul %5, %19, %cst_18 {dimension_numbers = #tpu.dot_dimension_numbers<[1], [0], [0], [1], [0, 0, 1, 1], [], []>} : vector<8x32xbf16>, vector<32x32xbf16>, vector<8x32xf32> -> vector<8x32xf32>
    %c1 = arith.constant 1 : index
    %c0_19 = arith.constant 0 : index
    %c0_20 = arith.constant 0 : index
    %21 = vector.load %arg8[%c1, %c0_19, %c0_20] : memref<3x1x32xf32, #tpu.memory_space<vmem>>, vector<1x1x32xf32>
    %22 = vector.shape_cast %21 : vector<1x1x32xf32> to vector<1x32xf32>
    %23 = vector.broadcast %22 : vector<1x32xf32> to vector<8x32xf32>
    %24 = arith.addf %20, %23 : vector<8x32xf32>
    %25 = arith.truncf %24 : vector<8x32xf32> to vector<8x32xbf16>
    %c0_21 = arith.constant 0 : index
    %c0_22 = arith.constant 0 : index
    %c0_23 = arith.constant 0 : index
    %26 = vector.load %arg10[%c0_21, %c0_22, %c0_23] : memref<1x8x32xbf16, #tpu.memory_space<vmem>>, vector<1x8x32xbf16>
    %27 = vector.shape_cast %26 : vector<1x8x32xbf16> to vector<8x32xbf16>
    %28 = vector.shape_cast %25 : vector<8x32xbf16> to vector<1x8x32xbf16>
    tpu.vector_store %arg10[%c0_21, %c0_22, %c0_23], %28 {strides = array<i32>} : memref<1x8x32xbf16, #tpu.memory_space<vmem>>, vector<1x8x32xbf16>,
    %c0_24 = arith.constant 0 : index
    %c0_25 = arith.constant 0 : index
    %29 = vector.load %arg7[%c0_24, %c0_25] : memref<32x32xbf16, #tpu.memory_space<vmem>>, vector<32x32xbf16>
    %cst_26 = arith.constant dense<0.000000e+00> : vector<8x32xf32>
    %30 = tpu.matmul %8, %29, %cst_26 {dimension_numbers = #tpu.dot_dimension_numbers<[1], [0], [0], [1], [0, 0, 1, 1], [], []>} : vector<8x32xbf16>, vector<32x32xbf16>, vector<8x32xf32> -> vector<8x32xf32>
    %c2 = arith.constant 2 : index
    %c0_27 = arith.constant 0 : index
    %c0_28 = arith.constant 0 : index
    %31 = vector.load %arg8[%c2, %c0_27, %c0_28] : memref<3x1x32xf32, #tpu.memory_space<vmem>>, vector<1x1x32xf32>
    %32 = vector.shape_cast %31 : vector<1x1x32xf32> to vector<1x32xf32>
    %33 = vector.broadcast %32 : vector<1x32xf32> to vector<8x32xf32>
    %34 = arith.addf %30, %33 : vector<8x32xf32>
    %35 = arith.truncf %34 : vector<8x32xf32> to vector<8x32xbf16>
    %c0_29 = arith.constant 0 : index
    %c0_30 = arith.constant 0 : index
    %c0_31 = arith.constant 0 : index
    %36 = vector.load %arg11[%c0_29, %c0_30, %c0_31] : memref<1x8x32xbf16, #tpu.memory_space<vmem>>, vector<1x8x32xbf16>
    %37 = vector.shape_cast %36 : vector<1x8x32xbf16> to vector<8x32xbf16>
    %38 = vector.shape_cast %35 : vector<8x32xbf16> to vector<1x8x32xbf16>
    tpu.vector_store %arg11[%c0_29, %c0_30, %c0_31], %38 {strides = array<i32>} : memref<1x8x32xbf16, #tpu.memory_space<vmem>>, vector<1x8x32xbf16>,
    return
  }
  func.func @transform_0(%arg0: i32, %arg1: i32) -> (i32, i32, i32) {
    %c0_i32 = arith.constant 0 : i32
    %c0_i32_0 = arith.constant 0 : i32
    return %arg0, %arg1, %c0_i32 : i32, i32, i32
  }
  func.func @transform_1(%arg0: i32, %arg1: i32) -> (i32, i32, i32) {
    %c0_i32 = arith.constant 0 : i32
    %c0_i32_0 = arith.constant 0 : i32
    return %arg0, %arg1, %c0_i32 : i32, i32, i32
  }
  func.func @transform_2(%arg0: i32, %arg1: i32) -> (i32, i32, i32) {
    %c0_i32 = arith.constant 0 : i32
    %c0_i32_0 = arith.constant 0 : i32
    return %arg0, %arg1, %c0_i32 : i32, i32, i32
  }
  func.func @transform_3(%arg0: i32, %arg1: i32) -> (i32, i32) {
    %c0_i32 = arith.constant 0 : i32
    %c0_i32_0 = arith.constant 0 : i32
    %c0_i32_1 = arith.constant 0 : i32
    return %c0_i32, %c0_i32_0 : i32, i32
  }
  func.func @transform_4(%arg0: i32, %arg1: i32) -> (i32, i32) {
    %c0_i32 = arith.constant 0 : i32
    %c0_i32_0 = arith.constant 0 : i32
    %c0_i32_1 = arith.constant 0 : i32
    return %c0_i32, %c0_i32_0 : i32, i32
  }
  func.func @transform_5(%arg0: i32, %arg1: i32) -> (i32, i32) {
    %c0_i32 = arith.constant 0 : i32
    %c0_i32_0 = arith.constant 0 : i32
    %c0_i32_1 = arith.constant 0 : i32
    return %c0_i32, %c0_i32_0 : i32, i32
  }
  func.func @transform_6(%arg0: i32, %arg1: i32) -> (i32, i32, i32) {
    %c0_i32 = arith.constant 0 : i32
    %c0_i32_0 = arith.constant 0 : i32
    %c0_i32_1 = arith.constant 0 : i32
    %c0_i32_2 = arith.constant 0 : i32
    return %c0_i32, %c0_i32_0, %c0_i32_1 : i32, i32, i32
  }
  func.func @transform_7(%arg0: i32, %arg1: i32) -> (i32, i32, i32) {
    %c0_i32 = arith.constant 0 : i32
    %c0_i32_0 = arith.constant 0 : i32
    return %arg0, %arg1, %c0_i32 : i32, i32, i32
  }
  func.func @transform_8(%arg0: i32, %arg1: i32) -> (i32, i32, i32) {
    %c0_i32 = arith.constant 0 : i32
    %c0_i32_0 = arith.constant 0 : i32
    return %arg0, %arg1, %c0_i32 : i32, i32, i32
  }
  func.func @transform_9(%arg0: i32, %arg1: i32) -> (i32, i32, i32) {
    %c0_i32 = arith.constant 0 : i32
    %c0_i32_0 = arith.constant 0 : i32
    return %arg0, %arg1, %c0_i32 : i32, i32, i32
  }
}

</mosaic_0001>

<bundles_post_ra>
// kernel: tpu_custom_call.1
= control target key start
LH: loop header
LB: loop body
LE: loop exit
PB: predicated region body
PF: predicated region fallthrough
CT: control target
= control target key end

     0   :  { %s1942_s0 = inlined_call_operand.hbm [shape: f32[2,8,32], index: 0, kind: input, shape index: {}]   ;;  %s1943_s1 = inlined_call_operand.hbm [shape: f32[2,8,32], index: 1, kind: input, shape index: {}]   ;;  %s1944_s2 = inlined_call_operand.hbm [shape: f32[2,8,32], index: 2, kind: input, shape index: {}]   ;;  %s1945_s3 = inlined_call_operand.hbm [shape: bf16[32,32], index: 3, kind: input, shape index: {}]   ;;  %s1946_s4 = inlined_call_operand.hbm [shape: bf16[32,32], index: 4, kind: input, shape index: {}]   ;;  %s1947_s5 = inlined_call_operand.vmem [shape: bf16[32,32], index: 5, kind: input, shape index: {}]   ;;  %s1948_s6 = inlined_call_operand.vmem [shape: f32[3,1,32], index: 6, kind: input, shape index: {}]   ;;  %s1949_s7 = inlined_call_operand.hbm [shape: bf16[2,8,32], index: 7, kind: output, shape index: {0}]   ;;  %s1950_s8 = inlined_call_operand.hbm [shape: bf16[2,8,32], index: 8, kind: output, shape index: {1}]   ;;  %s1951_s9 = inlined_call_operand.hbm [shape: bf16[2,8,32], index: 9, kind: output, shape index: {2}]  }
   0x1   :  { %1974 = sst [smem:[#allocation26_spill]] %s1943_s1 }
   0x2   :  { %1975 = sst [smem:[#allocation27_spill]] %s1945_s3 }
   0x3   :  { %1976 = sst [smem:[#allocation28_spill]] %s1946_s4 }
   0x4   :  { %1977 = sst [smem:[#allocation29_spill]] %s1951_s9 }
   0x5   :  { %15 = vsyncpa [#allocation3], 0 }
   0x6   :  { %17 = vsyncpa [#allocation3 + $0x1], 0 }
   0x7   :  { %18 = vsyncpa [#allocation6], 0 }
   0x8   :  { %20 = vsyncpa [#allocation6 + $0x1], 0 }
   0x9   :  { %21 = vsyncpa [#allocation9], 0 }
   0xa   :  { %22 = vsyncpa [#allocation4], 0 }
   0xb   :  { %24 = vsyncpa [#allocation4 + $0x1], 0 }
   0xc   :  { %25 = vsyncpa [#allocation13], 0 }
   0xd   :  { %27 = vsyncpa [#allocation13 + $0x1], 0  ;;  %s1517_s30 = smov 0   ;;  %s1519_s10 = smov 0  }
   0xe   :  { %s1521_s11 = smov 0   ;;  %s1523_s12 = smov 0  }
   0xf   :  { %s1525_s13 = smov 0   ;;  %s1527_s14 = smov 0  }
  0x10 LB: > { %1978 = sst [smem:[#allocation20_spill]] %s1433_s30  ;;  %s1548_s15 = sadd.s32 4294967295, %s1453_s14   ;;  %s1453_s14 = sphi %s1527_s14, %s33_s14   ;;  %s1449_s13 = sphi %s1525_s13, %s2019_s13   ;;  %s1445_s12 = sphi %s1523_s12, %s2018_s12   ;;  %s1441_s11 = sphi %s1521_s11, %s2022_s11   ;;  %s1437_s10 = sphi %s1519_s10, %s2021_s10   ;;  %s1433_s30 = sphi %s1517_s30, %s2020_s30  }
  0x11   : > { %1979 = sst [smem:[#allocation21_spill]] %s1449_s13  ;;  %s1952_s16 = sadd.s32 4294967294, %s1453_s14  }
  0x12   : > { %1980 = sst [smem:[#allocation22_spill]] %s1453_s14  ;;  %p67_p0 = scmp.ne.s32.totalorder %s1437_s10, %s1433_s30 }
  0x13   : > { %p1953_p1 = scmp.eq.s32.totalorder %s1548_s15, 0  ;;  %p239_p3 = scmp.eq.s32.totalorder %s1952_s16, 1 }
  0x14   : > { %p970_p5 = scmp.ge.s32.totalorder %s1453_s14, 1  ;;  %p302_p7 = scmp.lt.s32.totalorder %s1453_s14, 3 }
  0x15   : > { %p1559_p4 = por %p1953_p1, %p67_p0  ;;  %p1564_p6 = por %p239_p3, %p67_p0 }
  0x16   : > { %p1569_p8 = pnand %p970_p5, %p302_p7  ;;  %s1455_s20 = smov [#allocation8]  }
  0x17   : > { %s1981_s17 = scalar_select %p1559_p4, 1, 0 }
  0x18   : > { %s1982_s18 = scalar_select %p1564_p6, 1, 0 }
  0x19   : > { %s1984_s19 = scalar_select %p1569_p8, 1, 0 }
  0x1a   : > { %1983 = sst [smem:[#allocation23_spill]] %s1982_s18  ;;  %s314_s21 = sshll.u32 %s1455_s20, 4  ;;  %s315_s21 = int_to_ptr.vmem [resolvable:$true] %s314_s21 }
  0x1b   : > { %p1064_p9 = pneg %p1569_p8  ;;  %s45_s23 = sadd.s32 1, %s1449_s13 }
  0x1c   : > { %s1986_s3 = sld [smem:[#allocation27_spill]] }
  0x1d   : > { %p1578_p11 = pnand %p1064_p9, %p1953_p1 }
  0x1f   : > { %s1985_s22 = scalar_select %p1578_p11, 1, 0 }
  0x20   : > { %p1966_p13 = pneg %p1578_p11 }
  0x22   : > { %s1157_s26 = scalar_lea.hbm %s1986_s3, 256 }
  0x23   : > { %p1158_p12 = scmp.ne.s32.totalorder %s1986_s3, %s1157_s26  ;;  %p1164_p5 = scmp.lt.u32.totalorder %s1157_s26, %s1986_s3 }
  0x25   : > { %p1160_p0 = pnand %p1966_p13, %p1158_p12 }
  0x27   : > { %p1161_p3 = pneg %p1160_p0 }
  0x29   : > { %p1166_p7 = pnand %p1164_p5, %p1161_p3 }
  0x2b   : > { %1169 = shalt.err (!%p1166_p7)
}
  0x2c   : > { %s1170_s16 = scalar_lea.vmem %s315_s21, 256  ;;  %p1178_p2 = scmp.lt.s32.totalorder %s315_s21, %s315_s21 }
  0x2d   : > { %p1171_p9 = scmp.ne.s32.totalorder %s315_s21, %s1170_s16  ;;  %p1179_p6 = scmp.lt.s32.totalorder %s1170_s16, %s1170_s16 }
  0x2f   : > { %p1173_p10 = pnand %p1171_p9, %p1966_p13  ;;  %p1180_p4 = por %p1179_p6, %p1178_p2 }
  0x31   : > { %p1174_p1 = pneg %p1173_p10 }
  0x33   : > { %p1181_p8 = pnand %p1180_p4, %p1174_p1 }
  0x35   : > { %1184 = shalt.err (!%p1181_p8)
}
  0x36   : > { %s1956_s24 = smov 64   ;;  %s1957_s25 = smov 4  }
  0x37   : > { %1067 = dma.hbm_to_vmem [thread:$0]  (!%p1578_p11), %s1986_s3, 256, %s315_s21, [#allocation9], %s1956_s24, %s1956_s24, %s1957_s25  }
  0x38   : > { %p47_p1 = scmp.ge.s32.totalorder %s45_s23, 2  ;;  %s54_s27 = sadd.s32 1, %s1441_s11 }
  0x39   : > { %p61_p2 = scmp.ne.s32.totalorder %s1441_s11, %s1437_s10  ;;  %p62_p4 = scmp.eq.s32.totalorder %s1453_s14, 0 }
  0x3a   : > { %s2024_s23 = smov (%p47_p1, %s45_s23), 0  ;;  %p1988_p8 = scmp.eq.s32.totalorder %s1548_s15, 1 }
  0x3b   : > { %1987 = sst [smem:[#allocation24_spill]] %s2024_s23  ;;  %p63_p6 = por %p62_p4, %p61_p2 }
  0x3c   : > { %p1616_p10 = por %p1988_p8, %p61_p2  ;;  %s49_s29 = ssub.s32 %s1449_s13, %s2024_s23 }
  0x3d   : > { %p1093_p12 = scmp.lt.s32.totalorder %s1453_s14, 2  ;;  %p52_p0 = scmp.eq.s32.totalorder %s49_s29, 0 }
  0x3e   : > { %s1989_s28 = scalar_select %p1616_p10, 1, 0 }
  0x3f   : > { %s1959_s20 = sand.u32 1, %s1441_s11   ;;  %s1629_s16 = sshll.u32 %s1449_s13, 7 }
  0x40   : > { %s1626_s21 = sshll.u32 %s1959_s20, 3  ;;  %p1634_p3 = pnand %p1093_p12, %p63_p6 }
  0x41   : > { %s1632_s26 = scalar_select %p52_p0, %s1441_s11, %s54_s27  }
  0x42   : > { %s1991_s24 = scalar_select %p1634_p3, 1, 0 }
  0x43   : > { %1990 = sst [smem:[#allocation25_spill]] %s1632_s26  ;;  %s366_s25 = sand.u32 1, %s1453_s14  }
  0x44   : > { %s1992_s1 = sld [smem:[#allocation26_spill]]  ;;  %s370_s20 = scalar_lea.vmem [#allocation5], %s1626_s21 }
  0x45   : > { %s378_s13 = sshll.u32 %s370_s20, 4  ;;  %s1458_s27 = smov [#allocation10]   ;;  %s1646_s13 = int_to_ptr.vmem [resolvable:$true] %s378_s13 }
  0x46   : > { %s1648_s26 = sshll.u32 %s1458_s27, 4  ;;  %s1650_s18 = scalar_lea.sflag [#allocation6], %s366_s25  ;;  %s328_s26 = int_to_ptr.vmem [resolvable:$true] %s1648_s26 }
  0x47   : > { %p1656_p7 = pneg %p1634_p3 }
  0x49   : > { %s1993_s3 = scalar_select %p1656_p7, 1, 0 }
  0x4a   : > { %s1643_s29 = scalar_lea.hbm %s1992_s1, %s1629_s16  ;;  %s1190_s14 = scalar_lea.hbm %s1992_s1, 256 }
  0x4b   : > { %s1185_s30 = scalar_lea.hbm %s1643_s29, 128  ;;  %p1191_p2 = scmp.lt.u32.totalorder %s1643_s29, %s1992_s1 }
  0x4c   : > { %p1186_p5 = scmp.ne.s32.totalorder %s1643_s29, %s1185_s30  ;;  %p1192_p4 = scmp.lt.u32.totalorder %s1190_s14, %s1185_s30 }
  0x4d   : > { %p1194_p8 = scmp.lt.u32.totalorder %s1185_s30, %s1643_s29 }
  0x4e   : > { %p1188_p9 = pnand %p1656_p7, %p1186_p5  ;;  %p1193_p6 = por %p1192_p4, %p1191_p2 }
  0x50   : > { %p1189_p1 = pneg %p1188_p9  ;;  %p1195_p12 = por %p1194_p8, %p1193_p6 }
  0x52   : > { %p1196_p0 = pnand %p1195_p12, %p1189_p1 }
  0x54   : > { %1199 = shalt.err (!%p1196_p0)
}
  0x55   : > { %s1200_s25 = scalar_lea.vmem %s1646_s13, 128  ;;  %s1459_s23 = smov [#allocation5]  }
  0x56   : > { %p1201_p5 = scmp.ne.s32.totalorder %s1646_s13, %s1200_s25  ;;  %s1205_s20 = sshll.u32 %s1459_s23, 4  ;;  %s1206_s20 = int_to_ptr.vmem [resolvable:$false] %s1205_s20 }
  0x57   : > { %s1207_s9 = scalar_lea.vmem %s1206_s20, 256  ;;  %p1208_p10 = scmp.lt.s32.totalorder %s1646_s13, %s1206_s20 }
  0x58   : > { %p1203_p9 = pnand %p1201_p5, %p1656_p7  ;;  %p1209_p11 = scmp.lt.s32.totalorder %s1207_s9, %s1200_s25 }
  0x5a   : > { %p1204_p13 = pneg %p1203_p9  ;;  %p1210_p2 = por %p1209_p11, %p1208_p10 }
  0x5c   : > { %p1211_p4 = pnand %p1210_p2, %p1204_p13 }
  0x5e   : > { %1214 = shalt.err (!%p1211_p4)
}
  0x5f   : > { %1077 = dma.hbm_to_vmem [thread:$0]  (!%p1634_p3), %s1643_s29, 128, %s1646_s13, %s1650_s18  }
  0x60   : > { %s1994_s4 = sld [smem:[#allocation28_spill]]  ;;  %p1995_p11 = scmp.ne.s32.totalorder %s1985_s22, 0 }
  0x62   : > { %p1996_p13 = pneg %p1995_p11 }
  0x66   : > { %s1215_s27 = scalar_lea.hbm %s1994_s4, 256 }
  0x67   : > { %p1216_p1 = scmp.ne.s32.totalorder %s1994_s4, %s1215_s27  ;;  %p1222_p8 = scmp.lt.u32.totalorder %s1215_s27, %s1994_s4 }
  0x69   : > { %p1218_p10 = pnand %p1216_p1, %p1996_p13 }
  0x6b   : > { %p1219_p6 = pneg %p1218_p10 }
  0x6d   : > { %p1224_p12 = pnand %p1222_p8, %p1219_p6 }
  0x6f   : > { %1227 = shalt.err (!%p1224_p12)
}
  0x70   : > { %s1228_s13 = scalar_lea.vmem %s328_s26, 256  ;;  %p1997_p5 = pmov %p1996_p13 }
  0x71   : > { %p1229_p0 = scmp.ne.s32.totalorder %s328_s26, %s1228_s13  ;;  %p1236_p4 = scmp.lt.s32.totalorder %s328_s26, %s328_s26 }
  0x72   : > { %p1237_p3 = scmp.lt.s32.totalorder %s1228_s13, %s1228_s13 }
  0x73   : > { %p1231_p9 = pnand %p1229_p0, %p1997_p5 }
  0x74   : > { %p1238_p7 = por %p1237_p3, %p1236_p4 }
  0x75   : > { %p1232_p2 = pneg %p1231_p9 }
  0x77   : > { %p1239_p1 = pnand %p1238_p7, %p1232_p2 }
  0x79   : > { %1242 = shalt.err (!%p1239_p1)
}
  0x7a   : > { %s1998_s1 = smov 4   ;;  %s1999_s29 = smov 64  }
  0x7b   : > { %1070 = dma.hbm_to_vmem [thread:$0]  (!%p1995_p11), %s1994_s4, 256, %s328_s26, [#allocation9], %s1999_s29, %s1999_s29, %s1998_s1  }
  0x7c   : > { %s1708_s23 = scalar_lea.hbm %s1942_s0, %s1629_s16  ;;  %s351_s22 = scalar_lea.vmem [#allocation2], %s1626_s21 }
  0x7d   : > { %s359_s25 = sshll.u32 %s351_s22, 4  ;;  %s1717_s9 = scalar_lea.hbm %s1944_s2, %s1629_s16  ;;  %s1711_s25 = int_to_ptr.vmem [resolvable:$true] %s359_s25 }
  0x7e   : > { %s2000_s30 = sand.u32 1, %s1441_s11   ;;  %s1243_s1 = scalar_lea.hbm %s1708_s23, 128 }
  0x7f   : > { %s348_s26 = scalar_lea.sflag [#allocation3], %s2000_s30  ;;  %p1244_p3 = scmp.ne.s32.totalorder %s1708_s23, %s1243_s1 }
  0x80   : > { %p2001_p7 = scmp.ne.s32.totalorder %s1993_s3, 0  ;;  %s1248_s27 = scalar_lea.hbm %s1942_s0, 256 }
  0x81   : > { %p1249_p10 = scmp.lt.u32.totalorder %s1708_s23, %s1942_s0  ;;  %p1250_p6 = scmp.lt.u32.totalorder %s1248_s27, %s1243_s1 }
  0x82   : > { %p1246_p11 = pnand %p1244_p3, %p2001_p7  ;;  %p1252_p12 = scmp.lt.u32.totalorder %s1243_s1, %s1708_s23 }
  0x83   : > { %p1251_p8 = por %p1250_p6, %p1249_p10 }
  0x84   : > { %p1247_p13 = pneg %p1246_p11 }
  0x85   : > { %p1253_p0 = por %p1252_p12, %p1251_p8 }
  0x87   : > { %p1254_p5 = pnand %p1253_p0, %p1247_p13 }
  0x89   : > { %1257 = shalt.err (!%p1254_p5)
}
  0x8a   : > { %s1258_s16 = scalar_lea.vmem %s1711_s25, 128  ;;  %s1460_s20 = smov [#allocation2]  }
  0x8b   : > { %p1259_p9 = scmp.ne.s32.totalorder %s1711_s25, %s1258_s16  ;;  %s1263_s13 = sshll.u32 %s1460_s20, 4  ;;  %s1264_s13 = int_to_ptr.vmem [resolvable:$false] %s1263_s13 }
  0x8c   : > { %s1265_s4 = scalar_lea.vmem %s1264_s13, 256  ;;  %p1266_p1 = scmp.lt.s32.totalorder %s1711_s25, %s1264_s13 }
  0x8d   : > { %p1261_p2 = pnand %p1259_p9, %p2001_p7  ;;  %p1267_p3 = scmp.lt.s32.totalorder %s1265_s4, %s1258_s16 }
  0x8f   : > { %p1262_p4 = pneg %p1261_p2  ;;  %p1268_p11 = por %p1267_p3, %p1266_p1 }
  0x91   : > { %p1269_p10 = pnand %p1268_p11, %p1262_p4 }
  0x93   : > { %1272 = shalt.err (!%p1269_p10)
}
  0x94   : > { %p2002_p13 = scmp.ne.s32.totalorder %s1991_s24, 0  ;;  %s389_s30 = scalar_lea.vmem [#allocation7], %s1626_s21 }
  0x95   : > { %s397_s1 = sshll.u32 %s389_s30, 4  ;;  %s1273_s29 = scalar_lea.hbm %s1717_s9, 128  ;;  %s398_s1 = int_to_ptr.vmem [resolvable:$true] %s397_s1 }
  0x96   : > { %1074 = dma.hbm_to_vmem [thread:$0]  (!%p2002_p13), %s1708_s23, 128, %s1711_s25, %s348_s26  }
  0x97   : > { %p1274_p6 = scmp.ne.s32.totalorder %s1717_s9, %s1273_s29  ;;  %s1278_s22 = scalar_lea.hbm %s1944_s2, 256 }
  0x98   : > { %p1279_p0 = scmp.lt.u32.totalorder %s1717_s9, %s1944_s2  ;;  %p1280_p5 = scmp.lt.u32.totalorder %s1278_s22, %s1273_s29 }
  0x99   : > { %p1276_p8 = pnand %p1274_p6, %p2001_p7  ;;  %p1282_p2 = scmp.lt.u32.totalorder %s1273_s29, %s1717_s9 }
  0x9a   : > { %p1281_p9 = por %p1280_p5, %p1279_p0 }
  0x9b   : > { %p1277_p12 = pneg %p1276_p8 }
  0x9c   : > { %p1283_p4 = por %p1282_p2, %p1281_p9 }
  0x9e   : > { %p1284_p1 = pnand %p1283_p4, %p1277_p12 }
  0xa0   : > { %1287 = shalt.err (!%p1284_p1)
}
  0xa1   : > { %s1288_s21 = scalar_lea.vmem %s398_s1, 128  ;;  %s1461_s23 = smov [#allocation7]  }
  0xa2   : > { %p1289_p3 = scmp.ne.s32.totalorder %s398_s1, %s1288_s21  ;;  %s1293_s25 = sshll.u32 %s1461_s23, 4  ;;  %s1294_s25 = int_to_ptr.vmem [resolvable:$false] %s1293_s25 }
  0xa3   : > { %s1295_s26 = scalar_lea.vmem %s1294_s25, 256  ;;  %p1296_p6 = scmp.lt.s32.totalorder %s398_s1, %s1294_s25 }
  0xa4   : > { %p1291_p11 = pnand %p1289_p3, %p2001_p7  ;;  %p1297_p8 = scmp.lt.s32.totalorder %s1295_s26, %s1288_s21 }
  0xa6   : > { %p1292_p10 = pneg %p1291_p11  ;;  %p1298_p13 = por %p1297_p8, %p1296_p6 }
  0xa8   : > { %p1299_p0 = pnand %p1298_p13, %p1292_p10 }
  0xaa   : > { %1302 = shalt.err (!%p1299_p0)
}
  0xab   : > { %p2003_p5 = scmp.ne.s32.totalorder %s1991_s24, 0  ;;  %p2004_p12 = scmp.ne.s32.totalorder %s1984_s19, 0 }
  0xac   : > { %s1764_s3 = sand.u32 (!%p2004_p12), 1, %s1437_s10   ;;  %p2005_p7 = scmp.ne.s32.totalorder (!%p2004_p12), %s1981_s17, 0 }
  0xad   : > { %1080 = dma.hbm_to_vmem [thread:$0]  (!%p2003_p5), %s1717_s9, 128, %s398_s1, %s1650_s18  }
  0xae   : > { %406 = sbr.rel (%p2004_p12) target bundleno = 476 (0x1dc), region = 48  ;;  %s1767_s13 = sshll.u32 (!%p2004_p12), %s1764_s3, 3 }
  0xaf   : > { %s409_s4 = scalar_lea.sflag (!%p2004_p12), [#allocation3], %s1764_s3  ;;  %s412_s30 = scalar_lea.vmem (!%p2004_p12), [#allocation2], %s1767_s13 }
  0xb5   : > { %1412 = dma.done.wait (%p2005_p7), %s409_s4, 128  }
  0xb6   : > { %1414 = vsyncadd (%p2005_p7), %s409_s4, 4294967168  ;;  %s417_s18 = sand.u32 1, %s1548_s15   ;;  %s421_s24 = scalar_lea.vmem [#allocation5], %s1767_s13 }
  0xb7   : > { %s418_s19 = scalar_lea.sflag [#allocation6], %s417_s18 }
  0xb8   : > { %1416 = dma.done.wait (%p2005_p7), %s418_s19, 256  }
  0xb9   : > { %1418 = vsyncadd (%p2005_p7), %s418_s19, 4294967040  ;;  %s430_s9 = scalar_lea.vmem [#allocation7], %s1767_s13  ;;  %p2006_p13 = scmp.eq.s32.totalorder %s1548_s15, 0 }
  0xbb   : > { %1420 = dma.done.wait (%p2006_p13), [#allocation9], 512   ;;  %p2007_p9 = pmov %p2006_p13 }
  0xbc   : > { %v1462_v0 = vmov 0.0   ;;  %vm1463_vm0 = vmmov 0   ;;  %v1151_v1 = vld [vmem:[#allocation8] sm:$0xff]   ;;  %v1152_v2 = vld [vmem:[#allocation8 + $0x8] sm:$0xff]   ;;  %v1153_v3 = vld [vmem:[#allocation10] sm:$0xff]   ;;  %vm523_vm1 = vcmask 261120  }
  0xbd   : > { %1422 = vsyncadd (%p2007_p9), [#allocation9], 4294966784  ;;  %1020 = vmatprep.subr.bf16.mxu0 %v1462_v0  ;;  %1028 = vmatprep.subr.bf16.mxu1 %v1462_v0  ;;  %v494_v4 = vld [vmem:[%s412_s30] sm:$0xff]  ;;  %v496_v7 = vld [vmem:[%s421_s24] sm:$0xff]  ;;  %s1798_s27 = sshll.u32 %s1764_s3, 2  ;;  %s1807_s23 = sshll.u32 %s1445_s12, 6 }
  0xbe   : > { %1024 = vmatprep.mubr.msk.bf16.mxu0 %vm1463_vm0, %v1462_v0  ;;  %1032 = vmatprep.mubr.msk.bf16.mxu1 %vm1463_vm0, %v1462_v0  ;;  %v495_v5 = vpack.c.bf16 %v494_v4, %v494_v4  ;;  %v1155_v6 = vld [vmem:[#allocation10 + $0x8] sm:$0xff]   ;;  %v1154_v8 = vld [vmem:[%s1947_s5] sm:$0xff]   ;;  %v497_v9 = vpack.c.bf16 %v496_v7, %v496_v7  ;;  %s478_s25 = scalar_lea.vmem [#allocation11], %s1798_s27  ;;  %vm568_vm2 = vcmask 257024   ;;  %s485_s13 = scalar_lea.vmem [#allocation12], %s1798_s27 }
  0xbf   : > { %1021 = vmatpush3.bf16.msra.mxu0 %v1151_v1  ;;  %1029 = vmatpush3.bf16.msra.mxu1 %v1153_v3  ;;  %v1156_v10 = vld [vmem:[%s1947_s5 + $0x8] sm:$0xff]   ;;  %v989_v13 = vld [vmem:[%s1948_s6] ss:$0 sm:$0xff]  ;;  %v994_v15 = vld [vmem:[%s1948_s6 + $0x1] ss:$0 sm:$0xff]  ;;  %s733_s26 = sshll.u32 %s478_s25, 4  ;;  %s1817_s19 = scalar_lea.hbm %s1949_s7, %s1807_s23  ;;  %s1819_s26 = int_to_ptr.vmem [resolvable:$true] %s733_s26 }
  0xc0   : > { %1022 = vmatprep.subr.bf16.mxu0 %v1462_v0  ;;  %1030 = vmatprep.subr.bf16.mxu1 %v1462_v0  ;;  %v498_v11 = vld [vmem:[%s430_s9] sm:$0xff]  ;;  %s747_s4 = sshll.u32 %s485_s13, 4  ;;  %s1825_s17 = scalar_lea.hbm %s1950_s8, %s1807_s23  ;;  %s1827_s4 = int_to_ptr.vmem [resolvable:$true] %s747_s4 }
  0xc1   : > { %v499_v12 = vpack.c.bf16 %v498_v11, %v498_v11  ;;  %v999_v27 = vld [vmem:[%s1948_s6 + $0x2] ss:$0 sm:$0xff]  ;;  %s709_s14 = scalar_lea.sflag [#allocation4], %s1764_s3  ;;  %s1303_s22 = scalar_lea.vmem %s1819_s26, 64 }
  0xc2   : > { %p1304_p2 = scmp.ne.s32.totalorder %s1819_s26, %s1303_s22  ;;  %p2008_p4 = scmp.ne.s32.totalorder %s1989_s28, 0 }
  0xc3   : > { %1023 = vmatpush3.bf16.msra.mxu0 %v1152_v2  ;;  %1031 = vmatpush3.bf16.msra.mxu1 %v1155_v6  ;;  %s1464_s16 = smov [#allocation11]  }
  0xc4   : > { %1036 = vmatprep.subr.bf16.mxu0 %v1462_v0  ;;  %p1305_p1 = pnand %p1304_p2, %p2008_p4  ;;  %s1307_s20 = sshll.u32 %s1464_s16, 4  ;;  %s1308_s20 = int_to_ptr.vmem [resolvable:$false] %s1307_s20 }
  0xc5   : > { %s1309_s21 = scalar_lea.vmem %s1308_s20, 128  ;;  %p1310_p11 = scmp.lt.s32.totalorder %s1819_s26, %s1308_s20 }
  0xc6   : > { %1025 = vmatmul.mubr.msk.bf16.vlgmr.msra.gmra.mrb[0].mxu0 %vm523_vm1, %v495_v5  ;;  %1033 = vmatmul.mubr.msk.bf16.vlgmr.msra.gmra.mrb[0].mxu1 %vm523_vm1, %v497_v9  ;;  %p1306_p3 = pneg %p1305_p1  ;;  %p1311_p10 = scmp.lt.s32.totalorder %s1309_s21, %s1303_s22 }
  0xc7   : > { %1037 = vmatpush3.bf16.msra.mxu0 %v1154_v8  ;;  %1040 = vmatprep.mubr.msk.bf16.mxu0 %vm1463_vm0, %v1462_v0 }
  0xc8   : > { %1038 = vmatprep.subr.bf16.mxu0 %v1462_v0  ;;  %p1312_p6 = por %p1311_p10, %p1310_p11 }
  0xca   : > { %p1313_p8 = pnand %p1312_p6, %p1306_p3 }
  0xcb   : > { %1039 = vmatpush3.bf16.msra.mxu0 %v1156_v10 }
  0xce   : > { %1041 = vmatmul.mubr.msk.bf16.vlgmr.msra.gmra.mrb[4].mxu0 %vm523_vm1, %v499_v12 }
 0x199   : > { %v561_v14 = vpop.f32.mrb[0].mxu0  ;;  %v631_v19 = vpop.f32.mrb[0].mxu1 }
 0x19a   : > { %v562_v16 = vadd.f32 %v989_v13, %v561_v14  ;;  %v1026_v17 = vpop.f32.mrb[1].mxu0  ;;  %v632_v22 = vadd.f32 %v994_v15, %v631_v19  ;;  %v1034_v23 = vpop.f32.mrb[1].mxu1 }
 0x19b   : > { %v564_v18 = vpop.f32.mrb[2].mxu0  ;;  %v634_v24 = vpop.f32.mrb[2].mxu1 }
 0x19c   : > { %v567_v20 = vpack.c.bf16 %v562_v16, %v562_v16  ;;  %v1027_v21 = vpop.f32.mrb[3].mxu0  ;;  %v637_v25 = vpack.c.bf16 %v632_v22, %v632_v22  ;;  %v1035_v26 = vpop.f32.mrb[3].mxu1 }
 0x19e   : > { %569 = vst.msk [vmem:[%s478_s25] sm:$0xf] %vm568_vm2, %v567_v20 }
 0x19f   : > { %1316 = shalt.err (!%p1313_p8)
}
 0x1a0   : > { %s1317_s3 = scalar_lea.hbm %s1817_s19, 64  ;;  %s1321_s30 = scalar_lea.hbm %s1949_s7, 128 }
 0x1a1   : > { %p1318_p0 = scmp.ne.s32.totalorder %s1817_s19, %s1317_s3  ;;  %p1322_p7 = scmp.lt.u32.totalorder %s1817_s19, %s1949_s7 }
 0x1a2   : > { %p1323_p13 = scmp.lt.u32.totalorder %s1321_s30, %s1317_s3  ;;  %p1325_p2 = scmp.lt.u32.totalorder %s1317_s3, %s1817_s19 }
 0x1a3   : > { %p1319_p5 = pnand %p1318_p0, %p2008_p4 }
 0x1a4   : > { %p1324_p9 = por %p1323_p13, %p1322_p7 }
 0x1a5   : > { %p1320_p12 = pneg %p1319_p5 }
 0x1a6   : > { %p1326_p1 = por %p1325_p2, %p1324_p9 }
 0x1a8   : > { %p1327_p3 = pnand %p1326_p1, %p1320_p12 }
 0x1aa   : > { %1330 = shalt.err (!%p1327_p3)
}
 0x1ab   : > { %1058 = dma.vmem_to_hbm [thread:$0]  (%p2008_p4), %s1819_s26, 64, %s1817_s19, %s709_s14   ;;  %638 = vst.msk [vmem:[%s485_s13] sm:$0xf] %vm568_vm2, %v637_v25  ;;  %v700_v28 = vpop.f32.mrb[4].mxu0 }
 0x1ac   : > { %s492_s1 = scalar_lea.vmem [#allocation14], %s1798_s27  ;;  %s1865_s22 = scalar_lea.sflag [#allocation13], %s417_s18 }
 0x1ad   : > { %s1861_s29 = sshll.u32 %s492_s1, 4  ;;  %s1331_s16 = scalar_lea.vmem %s1827_s4, 64  ;;  %s762_s29 = int_to_ptr.vmem [resolvable:$true] %s1861_s29 }
 0x1ae   : > { %p1332_p11 = scmp.ne.s32.totalorder %s1827_s4, %s1331_s16  ;;  %s1465_s20 = smov [#allocation12]  }
 0x1af   : > { %s1335_s21 = sshll.u32 %s1465_s20, 4  ;;  %s1336_s21 = int_to_ptr.vmem [resolvable:$false] %s1335_s21 }
 0x1b0   : > { %p1333_p10 = pnand %p1332_p11, %p2008_p4  ;;  %s1337_s26 = scalar_lea.vmem %s1336_s21, 128 }
 0x1b1   : > { %p1338_p8 = scmp.lt.s32.totalorder %s1827_s4, %s1336_s21  ;;  %p1339_p0 = scmp.lt.s32.totalorder %s1337_s26, %s1331_s16 }
 0x1b2   : > { %p1334_p6 = pneg %p1333_p10 }
 0x1b3   : > { %p1340_p5 = por %p1339_p0, %p1338_p8 }
 0x1b5   : > { %p1341_p12 = pnand %p1340_p5, %p1334_p6 }
 0x1b7   : > { %1344 = shalt.err (!%p1341_p12)
}
 0x1b8   : > { %s1345_s15 = scalar_lea.hbm %s1825_s17, 64  ;;  %s1349_s19 = scalar_lea.hbm %s1950_s8, 128 }
 0x1b9   : > { %p1346_p7 = scmp.ne.s32.totalorder %s1825_s17, %s1345_s15  ;;  %p1350_p2 = scmp.lt.u32.totalorder %s1825_s17, %s1950_s8 }
 0x1ba   : > { %p1351_p1 = scmp.lt.u32.totalorder %s1349_s19, %s1345_s15  ;;  %p1353_p11 = scmp.lt.u32.totalorder %s1345_s15, %s1825_s17 }
 0x1bb   : > { %p1347_p13 = pnand %p1346_p7, %p2008_p4 }
 0x1bc   : > { %p1352_p3 = por %p1351_p1, %p1350_p2 }
 0x1bd   : > { %p1348_p9 = pneg %p1347_p13 }
 0x1be   : > { %p1354_p10 = por %p1353_p11, %p1352_p3 }
 0x1c0   : > { %p1355_p6 = pnand %p1354_p10, %p1348_p9 }
 0x1c2   : > { %1358 = shalt.err (!%p1355_p6)
}
 0x1c3   : > { %1059 = dma.vmem_to_hbm [thread:$0]  (%p2008_p4), %s1827_s4, 64, %s1825_s17, %s1865_s22   ;;  %v701_v29 = vadd.f32 %v999_v27, %v700_v28  ;;  %v1042_v30 = vpop.f32.mrb[5].mxu0 }
 0x1c4   : > { %v703_v31 = vpop.f32.mrb[6].mxu0  ;;  %s2009_s30 = sld [smem:[#allocation29_spill]]  ;;  %s1359_s16 = scalar_lea.vmem %s762_s29, 64 }
 0x1c5   : > { %v706_v32 = vpack.c.bf16 %v701_v29, %v701_v29  ;;  %v1043_v33 = vpop.f32.mrb[7].mxu0  ;;  %p1360_p8 = scmp.ne.s32.totalorder %s762_s29, %s1359_s16  ;;  %s1466_s4 = smov [#allocation14]  }
 0x1c6   : > { %s1363_s17 = sshll.u32 %s1466_s4, 4  ;;  %s1364_s17 = int_to_ptr.vmem [resolvable:$false] %s1363_s17 }
 0x1c7   : > { %707 = vst.msk [vmem:[%s492_s1] sm:$0xf] %vm568_vm2, %v706_v32  ;;  %p1361_p0 = pnand %p1360_p8, %p2008_p4  ;;  %s1365_s20 = scalar_lea.vmem %s1364_s17, 128 }
 0x1c8   : > { %p1366_p12 = scmp.lt.s32.totalorder %s762_s29, %s1364_s17  ;;  %p1367_p7 = scmp.lt.s32.totalorder %s1365_s20, %s1359_s16 }
 0x1c9   : > { %p1362_p5 = pneg %p1361_p0 }
 0x1ca   : > { %s2010_s24 = smov %s2009_s30  ;;  %s1893_s9 = scalar_lea.hbm %s2009_s30, %s1807_s23 }
 0x1cb   : > { %p1368_p13 = por %p1367_p7, %p1366_p12 }
 0x1cd   : > { %p1369_p9 = pnand %p1368_p13, %p1362_p5 }
 0x1cf   : > { %1372 = shalt.err (!%p1369_p9)
}
 0x1d0   : > { %s1373_s27 = scalar_lea.hbm %s1893_s9, 64  ;;  %s1377_s21 = scalar_lea.hbm %s2010_s24, 128 }
 0x1d1   : > { %p1374_p2 = scmp.ne.s32.totalorder %s1893_s9, %s1373_s27  ;;  %p1378_p11 = scmp.lt.u32.totalorder %s1893_s9, %s2010_s24 }
 0x1d2   : > { %p1379_p10 = scmp.lt.u32.totalorder %s1377_s21, %s1373_s27  ;;  %p1381_p8 = scmp.lt.u32.totalorder %s1373_s27, %s1893_s9 }
 0x1d3   : > { %p1375_p1 = pnand %p1374_p2, %p2008_p4 }
 0x1d4   : > { %p1380_p6 = por %p1379_p10, %p1378_p11 }
 0x1d5   : > { %p1376_p3 = pneg %p1375_p1 }
 0x1d6   : > { %p1382_p0 = por %p1381_p8, %p1380_p6 }
 0x1d8   : > { %p1383_p5 = pnand %p1382_p0, %p1376_p3 }
 0x1da   : > { %1386 = shalt.err (!%p1383_p5)
}
 0x1db   : > { %1060 = dma.vmem_to_hbm [thread:$0]  (%p2008_p4), %s762_s29, 64, %s1893_s9, %s1865_s22  }
 0x1dc PF: > { %s2011_s18 = sld [smem:[#allocation20_spill]]  ;;  %s2012_s13 = sld [smem:[#allocation23_spill]] }
 0x1dd   : > { %s2013_s19 = sld [smem:[#allocation22_spill]] }
 0x1e2   : > { %s773_s14 = sand.u32 1, %s2011_s18   ;;  %p2014_p12 = scmp.ne.s32.totalorder %s2012_s13, 0 }
 0x1e3   : > { %p2015_p7 = scmp.ge.s32.totalorder %s2013_s19, 2  ;;  %s774_s3 = scalar_lea.sflag [#allocation4], %s773_s14 }
 0x1e5   : > { %p1082_p13 = pnand %p2015_p7, %p2014_p12 }
 0x1e7   : > { %1424 = dma.done.wait (!%p1082_p13), %s774_s3, 64  }
 0x1e8   : > { %1426 = vsyncadd (!%p1082_p13), %s774_s3, 4294967232  ;;  %s2016_s25 = sadd.s32 4294967294, %s2013_s19  }
 0x1e9   : > { %s782_s12 = sand.u32 1, %s2016_s25  }
 0x1ea   : > { %s783_s30 = scalar_lea.sflag [#allocation13], %s782_s12 }
 0x1eb   : > { %1428 = dma.done.wait (!%p1082_p13), %s783_s30, 128  }
 0x1ec   : > { %1430 = vsyncadd (!%p1082_p13), %s783_s30, 4294967168  ;;  %s33_s14 = sadd.s32 1, %s2013_s19   ;;  %s2017_s28 = sld [smem:[#allocation25_spill]] }
 0x1ed   : > { %p30_p4 = scmp.ge.s32.totalorder %s33_s14, 4   ;;  %s2018_s12 = sld [smem:[#allocation21_spill]] }
 0x1ee   : > { %s2019_s13 = sld [smem:[#allocation24_spill]]  ;;  %s2020_s30 = smov %s1437_s10 }
 0x1ef   : > { %s2021_s10 = smov %s1441_s11  ;;  %32 = sbr.rel (!%p30_p4) target bundleno = 16 (0x10), region = 159 }
 0x1f2   : > { %s2022_s11 = smov %s2017_s28 }
 0x1f6   :  { %797 = vsyncpa [#allocation3], 1 }
 0x1f7   :  { %799 = vsyncpa [#allocation3 + $0x1], 1 }
 0x1f8   :  { %800 = vsyncpa [#allocation6], 1 }
 0x1f9   :  { %802 = vsyncpa [#allocation6 + $0x1], 1 }
 0x1fa   :  { %803 = vsyncpa [#allocation9], 1 }
 0x1fb   :  { %804 = vsyncpa [#allocation4], 1 }
 0x1fc   :  { %806 = vsyncpa [#allocation4 + $0x1], 1 }
 0x1fd   :  { %807 = vsyncpa [#allocation13], 1 }
 0x1fe   :  { %809 = vsyncpa [#allocation13 + $0x1], 1 }

</bundles_post_ra>
